<compile_context>
chip_gen: v7x
topology: tpu7x:2x2x1
jax: 0.10.0
libtpu: 0.0.40
codegen_flags: <defaults>
</compile_context>

<pallas_src>
import functools

import jax
import jax.numpy as jnp
from jax.experimental import pallas as pl
from jax.experimental.pallas import tpu as pltpu

_LANE = 128
_SUBLANE = 8
_OUT_ROWS = 8  # per-tile output block is (8, 128): fully lane/sublane aligned


def _round_up(x, m):
    return (x + m - 1) // m * m


def _tpu_vmem_capacity_bytes():
    """VMEM capacity in bytes; conservative fallback if the query is unavailable."""
    try:
        return int(pltpu.get_tpu_info().vmem_capacity_bytes)
    except Exception:
        return 64 * 1024 * 1024  # v7x per-TensorCore VMEM (smallest across gens)


def _focal_loss_kernel(logits_ref, targets_ref, alpha_ref, out_ref, *,
                       gamma, n_rows, tile_n):
    # logits_ref : (TILE_N, C)  raw scores (upcast to f32 in-kernel)
    # targets_ref: (TILE_N, 1)  int32 class ids
    # alpha_ref  : (TILE_N, 1)  alpha[target], pre-gathered in the wrapper
    # out_ref    : (8, 128)     per-tile partial loss sum (value replicated)
    logits = logits_ref[...].astype(jnp.float32)
    tn, c = logits.shape

    targets = targets_ref[...]                                   # (TILE_N, 1)
    class_ids = jax.lax.broadcasted_iota(jnp.int32, (tn, c), 1)
    eq = class_ids == targets                                    # boolean one-hot

    # Log-softmax gather of the target class: no (N,C) divide, no log(0).
    m = jnp.max(logits, axis=1, keepdims=True)                   # (TILE_N, 1)
    sum_exp = jnp.sum(jnp.exp(logits - m), axis=1, keepdims=True)
    log_z = m + jnp.log(sum_exp)
    logit_t = jnp.sum(jnp.where(eq, logits, 0.0), axis=1, keepdims=True)
    log_p = jnp.minimum(logit_t - log_z, 0.0)                    # <= 0 by construction
    p_t = jnp.exp(log_p)

    alpha_t = alpha_ref[...].astype(jnp.float32)                 # (TILE_N, 1)

    one_minus_p = 1.0 - p_t
    if gamma == 2.0:                       # gamma is a static Python float
        focal = one_minus_p * one_minus_p  # avoids exp/log pair from pow()
    elif gamma == 1.0:
        focal = one_minus_p
    elif gamma == 0.0:
        focal = jnp.ones_like(one_minus_p)
    else:
        focal = jnp.exp(jnp.float32(gamma) * jnp.log1p(-p_t))

    per_row = -alpha_t * focal * log_p                           # (TILE_N, 1)

    # Mask tail rows of the last (partial) tile; statically skipped when aligned.
    if n_rows % tile_n != 0:
        row = jax.lax.broadcasted_iota(jnp.int32, (tn, 1), 0)
        valid = (pl.program_id(0) * tile_n + row) < n_rows
        per_row = jnp.where(valid, per_row, 0.0)

    tile_sum = jnp.sum(per_row, axis=0, keepdims=True)           # (1, 1)
    out_ref[...] = jnp.broadcast_to(tile_sum, out_ref.shape)


def focal_loss(logits, targets, alpha, gamma=2.0, size_average=True,
               max_tile_rows=None):
    """Pallas implementation of FocalLoss.forward.

    logits:  (N, C) float array of unnormalized scores.
    targets: (N,)   int array of class indices.
    alpha:   (C,) or (C, 1) per-class scaling factors.
    """
    n, c = logits.shape
    if not jnp.issubdtype(logits.dtype, jnp.floating):
        logits = logits.astype(jnp.float32)
    itemsize = jnp.dtype(logits.dtype).itemsize

    # Generation-aware tile sizing: bigger tiles on 128 MiB v5e/v6e, tighter on v7x.
    vmem_cap = _tpu_vmem_capacity_bytes()
    if vmem_cap >= 96 * 1024 * 1024:        # v5e / v6e (128 MiB VMEM)
        pair_budget = 24 * 1024 * 1024      # double-buffered logits tile budget
        rows_limit = 16384
    else:                                    # v7x (64 MiB per TensorCore)
        pair_budget = 12 * 1024 * 1024
        rows_limit = 8192
    if max_tile_rows is not None:
        rows_limit = max_tile_rows
    vmem_limit = int(min(vmem_cap * 3 // 4, 96 * 1024 * 1024))

    # Row tile: multiple of 16 (bf16 sublane packing friendly); VMEM lane dim is
    # padded to 128 internally regardless of C, so budget against round_up(C, 128).
    c_vmem = _round_up(c, _LANE)
    rows_cap = max(_SUBLANE, (pair_budget // (2 * c_vmem * itemsize)) // 16 * 16)
    tile_n = int(min(rows_cap, rows_limit, _round_up(n, _SUBLANE)))
    tile_n = max(_SUBLANE, tile_n // _SUBLANE * _SUBLANE)
    num_tiles = int(pl.cdiv(n, tile_n))

    # O(N) prep in XLA (no copy of the dominant (N, C) array): targets as a column,
    # and the alpha gather pulled out of the per-element path.
    targets_col = jnp.asarray(targets, jnp.int32).reshape(n, 1)
    alpha_flat = jnp.asarray(alpha, jnp.float32).reshape(-1)
    alpha_col = alpha_flat[targets_col[:, 0]].reshape(n, 1)

    kernel = functools.partial(_focal_loss_kernel, gamma=float(gamma),
                               n_rows=n, tile_n=tile_n)

    cost = pl.CostEstimate(
        flops=10 * n * c,
        transcendentals=n * c + 3 * n,
        bytes_accessed=n * c * itemsize + 2 * n * 4 + num_tiles * _OUT_ROWS * _LANE * 4,
    )

    partials = pl.pallas_call(
        kernel,
        out_shape=jax.ShapeDtypeStruct((num_tiles * _OUT_ROWS, _LANE), jnp.float32),
        grid=(num_tiles,),
        in_specs=[
            pl.BlockSpec((tile_n, c), lambda i: (i, 0)),   # logits tile (full C extent)
            pl.BlockSpec((tile_n, 1), lambda i: (i, 0)),   # target ids
            pl.BlockSpec((tile_n, 1), lambda i: (i, 0)),   # alpha[target]
        ],
        out_specs=pl.BlockSpec((_OUT_ROWS, _LANE), lambda i: (i, 0)),
        compiler_params=pltpu.CompilerParams(
            dimension_semantics=("parallel",),
            vmem_limit_bytes=vmem_limit,
        ),
        cost_estimate=cost,
    )(logits, targets_col, alpha_col)

    # Tiny final reduction: one scalar per tile (value replicated across its block).
    per_tile = partials.reshape(num_tiles, _OUT_ROWS * _LANE)[:, 0]
    total = jnp.sum(per_tile)
    return total / jnp.float32(n) if size_average else total


def focal_loss_reference(logits, targets, alpha, gamma=2.0, size_average=True):
    """Pure-JAX reference matching the PyTorch module exactly."""
    n, c = logits.shape
    p = jax.nn.softmax(logits.astype(jnp.float32), axis=1)
    mask = jax.nn.one_hot(targets, c, dtype=jnp.float32)
    probs = jnp.sum(p * mask, axis=1, keepdims=True)
    a = jnp.asarray(alpha, jnp.float32).reshape(c)[targets].reshape(n, 1)
    batch_loss = -a * jnp.power(1.0 - probs, gamma) * jnp.log(probs)
    return jnp.mean(batch_loss) if size_average else jnp.sum(batch_loss)


if __name__ == "__main__":
    key = jax.random.PRNGKey(0)
    k1, k2, k3, k4 = jax.random.split(key, 4)

    # FocalLoss(class_num=4) on a batch of 8; alpha=None -> 0.25 * ones(C, 1).
    N, C = 8, 4
    logits = jax.random.normal(k1, (N, C), dtype=jnp.float32)
    targets = jax.random.randint(k2, (N,), 0, C, dtype=jnp.int32)
    alpha = jnp.full((C, 1), 0.25, dtype=jnp.float32)

    loss = jax.block_until_ready(
        focal_loss(logits, targets, alpha, gamma=2.0, size_average=True))
    ref = focal_loss_reference(logits, targets, alpha, gamma=2.0, size_average=True)
    assert jnp.allclose(loss, ref, atol=1e-5, rtol=1e-5), (loss, ref)

    # Second small check: non-aligned N and C exercise the partial-tile row mask
    # and the narrow-lane path; per-class alpha exercises the wrapper gather.
    N2, C2 = 100, 5
    logits2 = jax.random.normal(k3, (N2, C2), dtype=jnp.float32)
    targets2 = jax.random.randint(k4, (N2,), 0, C2, dtype=jnp.int32)
    alpha2 = jnp.linspace(0.1, 0.9, C2, dtype=jnp.float32).reshape(C2, 1)
    loss2 = jax.block_until_ready(
        focal_loss(logits2, targets2, alpha2, gamma=2.0, size_average=False))
    ref2 = focal_loss_reference(logits2, targets2, alpha2, gamma=2.0, size_average=False)
    assert jnp.allclose(loss2, ref2, atol=1e-4, rtol=1e-5), (loss2, ref2)

    print("KERNEL_OK")
</pallas_src>

<mosaic_0001>
module attributes {stable_mosaic.version = 11 : i64} {
  func.func @_focal_loss_kernel(%arg0: i32, %arg1: memref<8x4xf32, #tpu.memory_space<vmem>>, %arg2: memref<8x1xi32, #tpu.memory_space<vmem>>, %arg3: memref<8x1xf32, #tpu.memory_space<vmem>>, %arg4: memref<8x128xf32, #tpu.memory_space<vmem>>) attributes {dimension_semantics = [#tpu.dimension_semantics<parallel>], iteration_bounds = array<i64: 1>, scalar_prefetch = 0 : i64, scratch_operands = 0 : i64, tpu.core_type = #tpu.core_type<tc>, window_params = [{transform_indices = @transform_0, window_bounds = array<i64: 8, 4>}, {transform_indices = @transform_1, window_bounds = array<i64: 8, 1>}, {transform_indices = @transform_2, window_bounds = array<i64: 8, 1>}, {transform_indices = @transform_3, window_bounds = array<i64: 8, 128>}]} {
    %c0 = arith.constant 0 : index
    %c0_0 = arith.constant 0 : index
    %0 = vector.load %arg1[%c0, %c0_0] : memref<8x4xf32, #tpu.memory_space<vmem>>, vector<8x4xf32>
    %c0_1 = arith.constant 0 : index
    %c0_2 = arith.constant 0 : index
    %1 = vector.load %arg2[%c0_1, %c0_2] : memref<8x1xi32, #tpu.memory_space<vmem>>, vector<8x1xi32>
    %2 = tpu.iota {dimensions = array<i32: 1>} : vector<8x4xi32>
    %3 = vector.broadcast %1 : vector<8x1xi32> to vector<8x4xi32>
    %4 = arith.cmpi eq, %2, %3 : vector<8x4xi32>
    %cst = arith.constant dense<0xFF800000> : vector<8xf32>
    %5 = vector.multi_reduction <maximumf>, %0, %cst [1] : vector<8x4xf32> to vector<8xf32>
    %6 = vector.shape_cast %5 : vector<8xf32> to vector<8x1xf32>
    %7 = vector.broadcast %6 : vector<8x1xf32> to vector<8x4xf32>
    %8 = arith.subf %0, %7 : vector<8x4xf32>
    %9 = math.exp %8 : vector<8x4xf32>
    %cst_3 = arith.constant dense<0.000000e+00> : vector<8xf32>
    %10 = vector.multi_reduction <add>, %9, %cst_3 [1] : vector<8x4xf32> to vector<8xf32>
    %11 = vector.shape_cast %10 : vector<8xf32> to vector<8x1xf32>
    %12 = math.log %11 : vector<8x1xf32>
    %13 = arith.addf %6, %12 : vector<8x1xf32>
    %cst_4 = arith.constant 0.000000e+00 : f32
    %14 = vector.broadcast %cst_4 : f32 to vector<8x4xf32>
    %15 = arith.select %4, %0, %14 : vector<8x4xi1>, vector<8x4xf32>
    %cst_5 = arith.constant dense<0.000000e+00> : vector<8xf32>
    %16 = vector.multi_reduction <add>, %15, %cst_5 [1] : vector<8x4xf32> to vector<8xf32>
    %17 = vector.shape_cast %16 : vector<8xf32> to vector<8x1xf32>
    %18 = arith.subf %17, %13 : vector<8x1xf32>
    %cst_6 = arith.constant 0.000000e+00 : f32
    %19 = vector.broadcast %cst_6 : f32 to vector<8x1xf32>
    %20 = arith.minimumf %18, %19 : vector<8x1xf32>
    %21 = math.exp %20 : vector<8x1xf32>
    %c0_7 = arith.constant 0 : index
    %c0_8 = arith.constant 0 : index
    %22 = vector.load %arg3[%c0_7, %c0_8] : memref<8x1xf32, #tpu.memory_space<vmem>>, vector<8x1xf32>
    %cst_9 = arith.constant 1.000000e+00 : f32
    %23 = vector.broadcast %cst_9 : f32 to vector<8x1xf32>
    %24 = arith.subf %23, %21 : vector<8x1xf32>
    %25 = arith.mulf %24, %24 : vector<8x1xf32>
    %cst_10 = arith.constant 0.000000e+00 : f32
    %26 = vector.broadcast %cst_10 : f32 to vector<8x1xf32>
    %27 = arith.subf %26, %22 : vector<8x1xf32>
    %28 = arith.mulf %27, %25 : vector<8x1xf32>
    %29 = arith.mulf %28, %20 : vector<8x1xf32>
    %cst_11 = arith.constant dense<0.000000e+00> : vector<1xf32>
    %30 = vector.multi_reduction <add>, %29, %cst_11 [0] : vector<8x1xf32> to vector<1xf32>
    %31 = vector.shape_cast %30 : vector<1xf32> to vector<1x1xf32>
    %32 = vector.shape_cast %31 : vector<1x1xf32> to vector<1x1xf32>
    %33 = vector.broadcast %32 : vector<1x1xf32> to vector<8x128xf32>
    %c0_12 = arith.constant 0 : index
    %c0_13 = arith.constant 0 : index
    %34 = vector.load %arg4[%c0_12, %c0_13] : memref<8x128xf32, #tpu.memory_space<vmem>>, vector<8x128xf32>
    tpu.vector_store %arg4[%c0_12, %c0_13], %33 {strides = array<i32>} : memref<8x128xf32, #tpu.memory_space<vmem>>, vector<8x128xf32>,
    return
  }
  func.func @transform_0(%arg0: i32) -> (i32, i32) {
    %c0_i32 = arith.constant 0 : i32
    %c0_i32_0 = arith.constant 0 : i32
    return %arg0, %c0_i32 : i32, i32
  }
  func.func @transform_1(%arg0: i32) -> (i32, i32) {
    %c0_i32 = arith.constant 0 : i32
    %c0_i32_0 = arith.constant 0 : i32
    return %arg0, %c0_i32 : i32, i32
  }
  func.func @transform_2(%arg0: i32) -> (i32, i32) {
    %c0_i32 = arith.constant 0 : i32
    %c0_i32_0 = arith.constant 0 : i32
    return %arg0, %c0_i32 : i32, i32
  }
  func.func @transform_3(%arg0: i32) -> (i32, i32) {
    %c0_i32 = arith.constant 0 : i32
    %c0_i32_0 = arith.constant 0 : i32
    return %arg0, %c0_i32 : i32, i32
  }
}

</mosaic_0001>

<bundles_post_ra>
// kernel: tpu_custom_call.1
= control target key start
LH: loop header
LB: loop body
LE: loop exit
PB: predicated region body
PF: predicated region fallthrough
CT: control target
= control target key end

     0   :  { %vm23_vm0 = vcmask 31744   ;;  %s158_s0 = inlined_call_operand.vmem [shape: f32[8,4], index: 0, kind: input, shape index: {}]   ;;  %s159_s1 = inlined_call_operand.vmem [shape: s32[8,1], index: 1, kind: input, shape index: {}]   ;;  %s160_s2 = inlined_call_operand.vmem [shape: f32[8,1], index: 2, kind: input, shape index: {}]   ;;  %s161_s3 = inlined_call_operand.hbm [shape: f32[8,128], index: 3, kind: output, shape index: {}]  }
   0x1   :  { %v15_v0 = vld [vmem:[%s158_s0] sm:$0xff] }
   0x2   :  { %8 = vsyncpa [#allocation3], 0  ;;  %v24_v1 = vsel %vm23_vm0, %v15_v0, -inf  ;;  %v112_v2 = vmov 0   ;;  %v16_v3 = vld [vmem:[%s159_s1] sm:$0xff]  ;;  %v17_v7 = vlaneseq  ;;  %vm50_vm2 = vcmask 7168  }
   0x3   :  { %80 = vset.pattern.permute.xlu0 %v112_v2  ;;  %81 = vset.pattern.permute.xlu1 %v112_v2  ;;  %v44_v22 = vld [vmem:[%s160_s2] sm:$0xff]  ;;  %s113_s16 = smov [#allocation2]  }
   0x4   :  { %25 = vmax.xlane.f32.xlu0 %v24_v1  ;;  %v18_v8 = vand.u32 127, %v17_v7  ;;  %v47_v24 = vsub.f32 0.0, %v44_v22  ;;  %s70_s17 = sshll.u32 %s113_s16, 4  ;;  %s71_s17 = int_to_ptr.vmem [resolvable:$true] %s70_s17 }
   0x5   :  { %s88_s2 = scalar_lea.vmem %s71_s17, 128  ;;  %p93_p1 = scmp.lt.s32.totalorder %s71_s17, %s71_s17 }
   0x6   :  { %p89_p0 = scmp.ne.s32.totalorder %s71_s17, %s88_s2  ;;  %p94_p2 = scmp.lt.s32.totalorder %s88_s2, %s88_s2 }
   0x8   :  { %p95_p3 = por %p94_p2, %p93_p1 }
   0xa   :  { %p96_p4 = pnand %p95_p3, %p89_p0 }
  0x1a   :  { %20 = vperm.xlu0 %80, %v16_v3  }
  0x91   :  { %v26_v4 = vpop.xlane.xlu0 %25 }
  0x92   :  { %v27_v5 = vsub.f32 %v15_v0, %v26_v4 }
  0x94   :  { %v28_v6 = vmul.f32 1.442695, %v27_v5 }
  0x96   :  { %82 = vpow2.f32 %v28_v6 }
  0x99   :  { %v21_v9 = vpop.permute.xlu0 %20 }
  0x9a   :  { %vm22_vm1 = vcmp.eq.s32.totalorder %v18_v8, %v21_v9 }
  0x9b   :  { %v36_v11 = vsel %vm22_vm1, %v15_v0, 0.0 }
  0x9c   :  { %v37_v13 = vsel %vm23_vm0, %v36_v11, 0.0 }
  0xa0   :  { %v83_v10 = vpop.eup %82 }
  0xa1   :  { %v30_v12 = vsel %vm23_vm0, %v83_v10, 0.0 }
  0xa2   :  { %31 = vadd.xlane.f32.xlu1 %v30_v12 }
  0xa6   :  { %38 = vadd.xlane.f32.xlu1 %v37_v13 }
 0x12f   :  { %v32_v14 = vpop.xlane.xlu1 %31 }
 0x130   :  { %84 = vlog2.f32 %v32_v14 }
 0x133   :  { %v39_v17 = vpop.xlane.xlu1 %38 }
 0x13a   :  { %v85_v15 = vpop.eup %84 }
 0x13b   :  { %v34_v16 = vmul.f32 0.6931472, %v85_v15 }
 0x13d   :  { %v35_v18 = vadd.f32 %v34_v16, %v26_v4 }
 0x13f   :  { %v40_v19 = vsub.f32 %v39_v17, %v35_v18 }
 0x141   :  { %v41_v20 = vmin.f32 %v40_v19, 0.0 }
 0x143   :  { %v42_v21 = vmul.f32 1.442695, %v41_v20 }
 0x145   :  { %86 = vpow2.f32 %v42_v21 }
 0x14f   :  { %v87_v23 = vpop.eup %86 }
 0x150   :  { %v45_v25 = vsub.f32 1.0, %v87_v23 }
 0x152   :  { %v46_v26 = vmul.f32 %v45_v25, %v45_v25 }
 0x154   :  { %v48_v27 = vmul.f32 %v47_v24, %v46_v26 }
 0x156   :  { %v49_v28 = vmul.f32 %v48_v27, %v41_v20 }
 0x158   :  { %v51_v29 = vsel %vm50_vm2, %v49_v28, 0.0 }
 0x159   :  { %v52_v30 = vrot.slane %v51_v29, 4 }
 0x15b   :  { %v53_v31 = vadd.f32 %v52_v30, %v51_v29 }
 0x15d   :  { %v54_v32 = vrot.slane %v53_v31, 2 }
 0x15f   :  { %v55_v33 = vadd.f32 %v54_v32, %v53_v31 }
 0x161   :  { %v56_v34 = vrot.slane %v55_v33, 1 }
 0x163   :  { %v57_v35 = vadd.f32 %v56_v34, %v55_v33 }
 0x165   :  { %60 = vperm.xlu1 %81, %v57_v35  }
 0x1e4   :  { %v61_v36 = vpop.permute.xlu1 %60 }
 0x1e5   :  { %63 = vst [vmem:[#allocation2] sm:$0xff] %v61_v36 }
 0x1e6   :  { %99 = shalt.err (!%p96_p4)
}
 0x1e7   :  { %s100_s20 = scalar_lea.hbm %s161_s3, 128 }
 0x1e8   :  { %p101_p5 = scmp.ne.s32.totalorder %s161_s3, %s100_s20  ;;  %p104_p6 = scmp.lt.u32.totalorder %s100_s20, %s161_s3 }
 0x1ea   :  { %p106_p7 = pnand %p104_p6, %p101_p5 }
 0x1ec   :  { %109 = shalt.err (!%p106_p7)
}
 0x1ed   :  { %73 = dma.vmem_to_hbm [thread:$0]  %s71_s17, 128, %s161_s3, [#allocation3]  }
 0x1ee   :  { %110 = dma.done.wait [#allocation3], 128  }
 0x1ef   :  { %111 = vsyncadd [#allocation3], 4294967168 }
 0x1f0   :  { %77 = vsyncpa [#allocation3], 1 }

</bundles_post_ra>
